<compile_context>
chip_gen: v7x
topology: tpu7x:2x2x1
jax: 0.10.0
libtpu: 0.0.40
codegen_flags: <defaults>
</compile_context>

<pallas_src>
import functools
import math

import jax
import jax.numpy as jnp
from jax.experimental import pallas as pl
from jax.experimental.pallas import tpu as pltpu


LANE = 128
CHUNK_SUBLANES = 16                    # (16,128): 2 f32 vregs / 1 packed bf16 vreg
MIN_NODE_PAD = CHUNK_SUBLANES * LANE   # 2048 nodes: smallest tile / padding unit
_VMEM_TILE_BUDGET = 26 << 20           # double-buffered in+out bytes per grid step


# --------------------------------------------------------------------------
# Pallas kernel: elementwise spherical-harmonic polynomials, node-dense tiles
# --------------------------------------------------------------------------
def _sph_harm_kernel(xyz_ref, out_ref, *, lmax: int):
    # xyz_ref: (3, S, 128) tile   /   out_ref: (M, S, 128) tile
    S = xyz_ref.shape[1]
    CS = CHUNK_SUBLANES
    n_chunks = S // CS

    sqrt3 = math.sqrt(3.0)
    sqrt5 = math.sqrt(5.0)
    sqrt6 = math.sqrt(6.0)
    sqrt7 = math.sqrt(7.0)
    sqrt10 = math.sqrt(10.0)
    sqrt15 = math.sqrt(15.0)
    sqrt35 = math.sqrt(35.0)
    sqrt70 = math.sqrt(70.0)

    @pl.loop(0, n_chunks)
    def _(c):
        r = pl.multiple_of(c * CS, CS)
        sl = pl.ds(r, CS)

        # (1, CS, 128) slabs: trailing dims are full vregs (2x f32 / 1x bf16).
        x = xyz_ref[0:1, sl, :]
        y = xyz_ref[1:2, sl, :]
        z = xyz_ref[2:3, sl, :]

        def put(k, v):
            out_ref[k:k + 1, sl, :] = v.astype(out_ref.dtype)

        # ---- l = 1  (component normalization: * sqrt(3)) ----
        put(0, sqrt3 * x)
        put(1, sqrt3 * y)
        put(2, sqrt3 * z)

        if lmax >= 2:
            x2 = x * x
            y2 = y * y
            z2 = z * z
            xy = x * y
            xz = x * z
            yz = y * z
            z2mx2 = z2 - x2
            # ---- l = 2  (* sqrt(5)) ----
            put(3, sqrt15 * xz)
            put(4, sqrt15 * xy)
            put(5, sqrt5 * (y2 - 0.5 * (x2 + z2)))
            put(6, sqrt15 * yz)
            put(7, (sqrt15 / 2.0) * z2mx2)

        if lmax >= 3:
            x2z2 = x2 + z2
            three_z2_m_x2 = 3.0 * z2 - x2
            z2_m_3x2 = z2 - 3.0 * x2
            four_y2_m_x2z2 = 4.0 * y2 - x2z2
            c30 = sqrt7 * sqrt10 / 4.0
            c32 = sqrt7 * sqrt6 / 4.0
            # ---- l = 3  (* sqrt(7)) ----
            put(8, c30 * x * three_z2_m_x2)
            put(9, (sqrt7 * sqrt15) * xy * z)
            put(10, c32 * x * four_y2_m_x2z2)
            put(11, (sqrt7 * 0.5) * y * (2.0 * y2 - 3.0 * x2z2))
            put(12, c32 * z * four_y2_m_x2z2)
            put(13, (sqrt7 * sqrt15 / 2.0) * y * z2mx2)
            put(14, c30 * z * z2_m_3x2)

        if lmax >= 4:
            r2 = x2z2 + y2
            sev_y2_m_r2 = 7.0 * y2 - r2
            sev_y2_m_3r2 = 7.0 * y2 - 3.0 * r2
            c40 = 3.0 * sqrt35 / 2.0
            c41 = 3.0 * sqrt70 / 4.0
            c42 = 3.0 * sqrt5 / 2.0
            c43 = 3.0 * sqrt10 / 4.0
            # ---- l = 4  (* sqrt(9) = 3) ----
            put(15, c40 * xz * z2mx2)
            put(16, c41 * xy * three_z2_m_x2)
            put(17, c42 * xz * sev_y2_m_r2)
            put(18, c43 * xy * sev_y2_m_3r2)
            put(19, (3.0 / 8.0) * (35.0 * y2 * y2 - 30.0 * y2 * r2 + 3.0 * r2 * r2))
            put(20, c43 * yz * sev_y2_m_3r2)
            put(21, (3.0 * sqrt5 / 4.0) * z2mx2 * sev_y2_m_r2)
            put(22, c41 * yz * z2_m_3x2)
            put(23, (3.0 * sqrt35 / 8.0) * (z2 * z2 - 6.0 * z2 * x2 + x2 * x2))


# --------------------------------------------------------------------------
# Wrapper (== SphericalHarmonics.forward)
# --------------------------------------------------------------------------
def _round_up(a: int, b: int) -> int:
    return (a + b - 1) // b * b


def spherical_harmonics(input_tensor, lmax: int = 4, pad_tensors: bool = True, *,
                        tile_nodes: int = 65536, out_dtype=jnp.float32,
                        node_last: bool = False, input_node_last: bool = False):
    """Forward pass of SphericalHarmonics(lmax, pad_tensors).

    node_last=True       : return the kernel-native (M, n_pad) node-last layout
                            (INCLUDES zero padding rows) and skip the wrapper
                            output transpose entirely.
    input_node_last=True  : coords are already (3, ...) node-last; skips the
                            wrapper-side input transpose.
    out_dtype=bfloat16    : halves the dominant HBM write stream (recommended
                            when ~3 decimal digits suffice for l=4 terms).
    """
    if not (1 <= lmax <= 4):
        raise NotImplementedError("Kernels implemented for lmax in [1, 4].")
    m = (lmax + 1) ** 2 - 1             # l = 1..lmax concatenated

    if input_node_last:
        assert input_tensor.shape[0] == 3, (
            f"Expected first input dimension to be 3 (x,y,z). Got {input_tensor.shape[0]}")
        lead_shape = input_tensor.shape[1:]
        flat_t = jnp.reshape(input_tensor, (3, -1)).astype(jnp.float32)   # (3, n)
    else:
        assert input_tensor.shape[-1] == 3, (
            f"Expected last input dimension to be 3 (x,y,z). Got {input_tensor.shape[-1]}")
        lead_shape = input_tensor.shape[:-1]
        flat_t = jnp.reshape(input_tensor, (-1, 3)).astype(jnp.float32).T  # (3, n)
    n = flat_t.shape[1]

    # ---- tile selection -------------------------------------------------
    out_itemsize = jnp.dtype(out_dtype).itemsize
    bytes_per_node_db = 2 * (3 * 4 + m * out_itemsize)     # double-buffered in+out
    budget_tile = max(MIN_NODE_PAD,
                      (_VMEM_TILE_BUDGET // bytes_per_node_db) // MIN_NODE_PAD * MIN_NODE_PAD)
    tile = max(MIN_NODE_PAD, _round_up(int(tile_nodes), MIN_NODE_PAD))
    tile = min(tile, budget_tile)

    # Pad node count to the tile unit (never power-of-two: waste < one unit).
    n_base = _round_up(max(n, 1), MIN_NODE_PAD)
    if n_base >= 2 * MIN_NODE_PAD:
        # Guarantee >= 2 grid steps: both v7x TensorCores get work and the
        # input/output DMA pipeline has something to overlap with.
        half = _round_up((n_base + 1) // 2, MIN_NODE_PAD)
        tile = min(tile, half)
    tile = min(tile, n_base)
    n_pad = _round_up(n_base, tile)
    nb = n_pad // LANE                  # node sublane-blocks
    sub_per_tile = tile // LANE         # sublane-blocks per grid step (mult. of 16)
    grid_steps = n_pad // tile

    # Node-last, padded, node axis spanning (sublane, lane).
    xyz = jnp.zeros((3, n_pad), jnp.float32).at[:, :n].set(flat_t).reshape(3, nb, LANE)

    vmem_limit = int(min(32 << 20, max(16 << 20, tile * bytes_per_node_db + (2 << 20))))

    out = pl.pallas_call(
        functools.partial(_sph_harm_kernel, lmax=lmax),
        out_shape=jax.ShapeDtypeStruct((m, nb, LANE), out_dtype),
        grid=(grid_steps,),
        in_specs=[pl.BlockSpec((3, sub_per_tile, LANE), lambda i: (0, i, 0))],
        out_specs=pl.BlockSpec((m, sub_per_tile, LANE), lambda i: (0, i, 0)),
        compiler_params=pltpu.CompilerParams(
            dimension_semantics=("parallel",),
            vmem_limit_bytes=vmem_limit),
    )(xyz)

    if node_last:
        # Kernel-native layout, padded node count included -- caller must slice
        # to the real node count themselves.
        return out.reshape(m, n_pad)

    # Module semantics: (..., M).  Slice BEFORE transposing so padded rows are
    # never part of the (XLA) transpose; pass node_last=True to skip it fully.
    result = out.reshape(m, n_pad)[:, :n].T
    return jnp.reshape(result, (*lead_shape, m))


# --------------------------------------------------------------------------
# Pure-JAX reference (same formulas) for a sanity check of the kernel plumbing
# --------------------------------------------------------------------------
def _reference(coords, lmax):
    x, y, z = coords[..., 0], coords[..., 1], coords[..., 2]
    x2, y2, z2 = x * x, y * y, z * z
    s3, s5, s7 = math.sqrt(3.0), math.sqrt(5.0), math.sqrt(7.0)
    s6, s10, s15, s35, s70 = (math.sqrt(v) for v in (6.0, 10.0, 15.0, 35.0, 70.0))
    cols = [s3 * x, s3 * y, s3 * z]
    if lmax >= 2:
        cols += [s15 * x * z, s15 * x * y, s5 * (y2 - 0.5 * (x2 + z2)),
                 s15 * y * z, (s15 / 2) * (z2 - x2)]
    if lmax >= 3:
        x2z2 = x2 + z2
        cols += [s7 * s10 / 4 * x * (3 * z2 - x2), s7 * s15 * x * y * z,
                 s7 * s6 / 4 * x * (4 * y2 - x2z2),
                 s7 * 0.5 * y * (2 * y2 - 3 * x2z2),
                 s7 * s6 / 4 * z * (4 * y2 - x2z2),
                 s7 * s15 / 2 * y * (z2 - x2), s7 * s10 / 4 * z * (z2 - 3 * x2)]
    if lmax >= 4:
        r2 = x2 + y2 + z2
        cols += [3 * s35 / 2 * x * z * (z2 - x2), 3 * s70 / 4 * x * y * (3 * z2 - x2),
                 3 * s5 / 2 * x * z * (7 * y2 - r2), 3 * s10 / 4 * x * y * (7 * y2 - 3 * r2),
                 3 / 8 * (35 * y2 * y2 - 30 * y2 * r2 + 3 * r2 * r2),
                 3 * s10 / 4 * y * z * (7 * y2 - 3 * r2),
                 3 * s5 / 4 * (z2 - x2) * (7 * y2 - r2),
                 3 * s70 / 4 * y * z * (z2 - 3 * x2),
                 3 * s35 / 8 * (z2 * z2 - 6 * z2 * x2 + x2 * x2)]
    return jnp.stack(cols, axis=-1)


if __name__ == "__main__":
    key = jax.random.PRNGKey(0)
    k1, k2, k3, k4 = jax.random.split(key, 4)

    # Case 1: n = 100 (non tile-multiple -> padding path), lmax = 4, f32 output.
    coords = jax.random.normal(k1, (100, 3), dtype=jnp.float32)
    out = jax.block_until_ready(spherical_harmonics(coords, lmax=4))
    assert out.shape == (100, 24), out.shape
    assert jnp.allclose(out, _reference(coords, 4), rtol=1e-4, atol=1e-4), \
        "lmax=4 kernel/ref mismatch"

    # Case 2: batched leading shape, lmax = 3.
    coords_b = jax.random.normal(k2, (2, 37, 3), dtype=jnp.float32)
    out_b = jax.block_until_ready(spherical_harmonics(coords_b, lmax=3))
    assert out_b.shape == (2, 37, 15), out_b.shape
    assert jnp.allclose(out_b, _reference(coords_b, 3), rtol=1e-4, atol=1e-4), \
        "lmax=3 kernel/ref mismatch"

    # Case 3: multi-tile grid (n > tile_nodes), odd n, lmax = 2 -> exercises the
    # grid index_map, the >=2-step split and the padding strip.
    coords_m = jax.random.normal(k3, (5000, 3), dtype=jnp.float32)
    out_m = jax.block_until_ready(
        spherical_harmonics(coords_m, lmax=2, tile_nodes=2048))
    assert out_m.shape == (5000, 8), out_m.shape
    assert jnp.allclose(out_m, _reference(coords_m, 2), rtol=1e-4, atol=1e-4), \
        "lmax=2 multi-tile kernel/ref mismatch"

    # Case 4: bf16 output (packed full-vreg stores) + node_last fast path + lmax=1.
    coords_h = jax.random.normal(k4, (300, 3), dtype=jnp.float32)
    out_h = jax.block_until_ready(
        spherical_harmonics(coords_h, lmax=4, out_dtype=jnp.bfloat16))
    assert out_h.shape == (300, 24) and out_h.dtype == jnp.bfloat16
    assert jnp.allclose(out_h.astype(jnp.float32), _reference(coords_h, 4),
                        rtol=3e-2, atol=3e-2), "bf16 output path mismatch"
    out_nl = jax.block_until_ready(
        spherical_harmonics(coords_h, lmax=1, node_last=True))
    assert out_nl.shape[0] == 3 and out_nl.shape[1] % MIN_NODE_PAD == 0
    assert jnp.allclose(out_nl[:, :300].T, _reference(coords_h, 1),
                        rtol=1e-4, atol=1e-4), "lmax=1 node_last path mismatch"

    # TODO(synk): backward pass (torch.autograd.Function.backward) not implemented.
    print("KERNEL_OK")
</pallas_src>

<mosaic_0001>
module attributes {stable_mosaic.version = 11 : i64} {
  func.func @_sph_harm_kernel(%arg0: i32, %arg1: memref<3x16x128xf32, #tpu.memory_space<vmem>>, %arg2: memref<24x16x128xf32, #tpu.memory_space<vmem>>) attributes {dimension_semantics = [#tpu.dimension_semantics<parallel>], iteration_bounds = array<i64: 1>, scalar_prefetch = 0 : i64, scratch_operands = 0 : i64, tpu.core_type = #tpu.core_type<tc>, window_params = [{transform_indices = @transform_0, window_bounds = array<i64: 3, 16, 128>}, {transform_indices = @transform_1, window_bounds = array<i64: 24, 16, 128>}]} {
    %c0_i32 = arith.constant 0 : i32
    %c1_i32 = arith.constant 1 : i32
    %0 = arith.muli %c0_i32, %c1_i32 : i32
    %c0_i32_0 = arith.constant 0 : i32
    %1 = arith.addi %c0_i32_0, %0 : i32
    %c16_i32 = arith.constant 16 : i32
    %2 = arith.muli %1, %c16_i32 : i32
    %3 = tpu.assume_multiple %2, 16 : i32
    %c0 = arith.constant 0 : index
    %4 = arith.index_cast %3 : i32 to index
    %c0_1 = arith.constant 0 : index
    %5 = vector.load %arg1[%c0, %4, %c0_1] : memref<3x16x128xf32, #tpu.memory_space<vmem>>, vector<1x16x128xf32>
    %c1 = arith.constant 1 : index
    %6 = arith.index_cast %3 : i32 to index
    %c0_2 = arith.constant 0 : index
    %7 = vector.load %arg1[%c1, %6, %c0_2] : memref<3x16x128xf32, #tpu.memory_space<vmem>>, vector<1x16x128xf32>
    %c2 = arith.constant 2 : index
    %8 = arith.index_cast %3 : i32 to index
    %c0_3 = arith.constant 0 : index
    %9 = vector.load %arg1[%c2, %8, %c0_3] : memref<3x16x128xf32, #tpu.memory_space<vmem>>, vector<1x16x128xf32>
    %cst = arith.constant 1.73205078 : f32
    %10 = vector.broadcast %cst : f32 to vector<1x16x128xf32>
    %11 = arith.mulf %10, %5 : vector<1x16x128xf32>
    %c0_4 = arith.constant 0 : index
    %12 = arith.index_cast %3 : i32 to index
    %c0_5 = arith.constant 0 : index
    %13 = vector.load %arg2[%c0_4, %12, %c0_5] : memref<24x16x128xf32, #tpu.memory_space<vmem>>, vector<1x16x128xf32>
    tpu.vector_store %arg2[%c0_4, %12, %c0_5], %11 {strides = array<i32>} : memref<24x16x128xf32, #tpu.memory_space<vmem>>, vector<1x16x128xf32>,
    %cst_6 = arith.constant 1.73205078 : f32
    %14 = vector.broadcast %cst_6 : f32 to vector<1x16x128xf32>
    %15 = arith.mulf %14, %7 : vector<1x16x128xf32>
    %c1_7 = arith.constant 1 : index
    %16 = arith.index_cast %3 : i32 to index
    %c0_8 = arith.constant 0 : index
    %17 = vector.load %arg2[%c1_7, %16, %c0_8] : memref<24x16x128xf32, #tpu.memory_space<vmem>>, vector<1x16x128xf32>
    tpu.vector_store %arg2[%c1_7, %16, %c0_8], %15 {strides = array<i32>} : memref<24x16x128xf32, #tpu.memory_space<vmem>>, vector<1x16x128xf32>,
    %cst_9 = arith.constant 1.73205078 : f32
    %18 = vector.broadcast %cst_9 : f32 to vector<1x16x128xf32>
    %19 = arith.mulf %18, %9 : vector<1x16x128xf32>
    %c2_10 = arith.constant 2 : index
    %20 = arith.index_cast %3 : i32 to index
    %c0_11 = arith.constant 0 : index
    %21 = vector.load %arg2[%c2_10, %20, %c0_11] : memref<24x16x128xf32, #tpu.memory_space<vmem>>, vector<1x16x128xf32>
    tpu.vector_store %arg2[%c2_10, %20, %c0_11], %19 {strides = array<i32>} : memref<24x16x128xf32, #tpu.memory_space<vmem>>, vector<1x16x128xf32>,
    %22 = arith.mulf %5, %5 : vector<1x16x128xf32>
    %23 = arith.mulf %7, %7 : vector<1x16x128xf32>
    %24 = arith.mulf %9, %9 : vector<1x16x128xf32>
    %25 = arith.mulf %5, %7 : vector<1x16x128xf32>
    %26 = arith.mulf %5, %9 : vector<1x16x128xf32>
    %27 = arith.mulf %7, %9 : vector<1x16x128xf32>
    %28 = arith.subf %24, %22 : vector<1x16x128xf32>
    %cst_12 = arith.constant 3.87298346 : f32
    %29 = vector.broadcast %cst_12 : f32 to vector<1x16x128xf32>
    %30 = arith.mulf %29, %26 : vector<1x16x128xf32>
    %c3 = arith.constant 3 : index
    %31 = arith.index_cast %3 : i32 to index
    %c0_13 = arith.constant 0 : index
    %32 = vector.load %arg2[%c3, %31, %c0_13] : memref<24x16x128xf32, #tpu.memory_space<vmem>>, vector<1x16x128xf32>
    tpu.vector_store %arg2[%c3, %31, %c0_13], %30 {strides = array<i32>} : memref<24x16x128xf32, #tpu.memory_space<vmem>>, vector<1x16x128xf32>,
    %cst_14 = arith.constant 3.87298346 : f32
    %33 = vector.broadcast %cst_14 : f32 to vector<1x16x128xf32>
    %34 = arith.mulf %33, %25 : vector<1x16x128xf32>
    %c4 = arith.constant 4 : index
    %35 = arith.index_cast %3 : i32 to index
    %c0_15 = arith.constant 0 : index
    %36 = vector.load %arg2[%c4, %35, %c0_15] : memref<24x16x128xf32, #tpu.memory_space<vmem>>, vector<1x16x128xf32>
    tpu.vector_store %arg2[%c4, %35, %c0_15], %34 {strides = array<i32>} : memref<24x16x128xf32, #tpu.memory_space<vmem>>, vector<1x16x128xf32>,
    %37 = arith.addf %22, %24 : vector<1x16x128xf32>
    %cst_16 = arith.constant 5.000000e-01 : f32
    %38 = vector.broadcast %cst_16 : f32 to vector<1x16x128xf32>
    %39 = arith.mulf %38, %37 : vector<1x16x128xf32>
    %40 = arith.subf %23, %39 : vector<1x16x128xf32>
    %cst_17 = arith.constant 2.23606801 : f32
    %41 = vector.broadcast %cst_17 : f32 to vector<1x16x128xf32>
    %42 = arith.mulf %41, %40 : vector<1x16x128xf32>
    %c5 = arith.constant 5 : index
    %43 = arith.index_cast %3 : i32 to index
    %c0_18 = arith.constant 0 : index
    %44 = vector.load %arg2[%c5, %43, %c0_18] : memref<24x16x128xf32, #tpu.memory_space<vmem>>, vector<1x16x128xf32>
    tpu.vector_store %arg2[%c5, %43, %c0_18], %42 {strides = array<i32>} : memref<24x16x128xf32, #tpu.memory_space<vmem>>, vector<1x16x128xf32>,
    %cst_19 = arith.constant 3.87298346 : f32
    %45 = vector.broadcast %cst_19 : f32 to vector<1x16x128xf32>
    %46 = arith.mulf %45, %27 : vector<1x16x128xf32>
    %c6 = arith.constant 6 : index
    %47 = arith.index_cast %3 : i32 to index
    %c0_20 = arith.constant 0 : index
    %48 = vector.load %arg2[%c6, %47, %c0_20] : memref<24x16x128xf32, #tpu.memory_space<vmem>>, vector<1x16x128xf32>
    tpu.vector_store %arg2[%c6, %47, %c0_20], %46 {strides = array<i32>} : memref<24x16x128xf32, #tpu.memory_space<vmem>>, vector<1x16x128xf32>,
    %cst_21 = arith.constant 1.93649173 : f32
    %49 = vector.broadcast %cst_21 : f32 to vector<1x16x128xf32>
    %50 = arith.mulf %49, %28 : vector<1x16x128xf32>
    %c7 = arith.constant 7 : index
    %51 = arith.index_cast %3 : i32 to index
    %c0_22 = arith.constant 0 : index
    %52 = vector.load %arg2[%c7, %51, %c0_22] : memref<24x16x128xf32, #tpu.memory_space<vmem>>, vector<1x16x128xf32>
    tpu.vector_store %arg2[%c7, %51, %c0_22], %50 {strides = array<i32>} : memref<24x16x128xf32, #tpu.memory_space<vmem>>, vector<1x16x128xf32>,
    %53 = arith.addf %22, %24 : vector<1x16x128xf32>
    %cst_23 = arith.constant 3.000000e+00 : f32
    %54 = vector.broadcast %cst_23 : f32 to vector<1x16x128xf32>
    %55 = arith.mulf %54, %24 : vector<1x16x128xf32>
    %56 = arith.subf %55, %22 : vector<1x16x128xf32>
    %cst_24 = arith.constant 3.000000e+00 : f32
    %57 = vector.broadcast %cst_24 : f32 to vector<1x16x128xf32>
    %58 = arith.mulf %57, %22 : vector<1x16x128xf32>
    %59 = arith.subf %24, %58 : vector<1x16x128xf32>
    %cst_25 = arith.constant 4.000000e+00 : f32
    %60 = vector.broadcast %cst_25 : f32 to vector<1x16x128xf32>
    %61 = arith.mulf %60, %23 : vector<1x16x128xf32>
    %62 = arith.subf %61, %53 : vector<1x16x128xf32>
    %cst_26 = arith.constant 2.091650e+00 : f32
    %63 = vector.broadcast %cst_26 : f32 to vector<1x16x128xf32>
    %64 = arith.mulf %63, %5 : vector<1x16x128xf32>
    %65 = arith.mulf %64, %56 : vector<1x16x128xf32>
    %c8 = arith.constant 8 : index
    %66 = arith.index_cast %3 : i32 to index
    %c0_27 = arith.constant 0 : index
    %67 = vector.load %arg2[%c8, %66, %c0_27] : memref<24x16x128xf32, #tpu.memory_space<vmem>>, vector<1x16x128xf32>
    tpu.vector_store %arg2[%c8, %66, %c0_27], %65 {strides = array<i32>} : memref<24x16x128xf32, #tpu.memory_space<vmem>>, vector<1x16x128xf32>,
    %cst_28 = arith.constant 10.2469511 : f32
    %68 = vector.broadcast %cst_28 : f32 to vector<1x16x128xf32>
    %69 = arith.mulf %68, %25 : vector<1x16x128xf32>
    %70 = arith.mulf %69, %9 : vector<1x16x128xf32>
    %c9 = arith.constant 9 : index
    %71 = arith.index_cast %3 : i32 to index
    %c0_29 = arith.constant 0 : index
    %72 = vector.load %arg2[%c9, %71, %c0_29] : memref<24x16x128xf32, #tpu.memory_space<vmem>>, vector<1x16x128xf32>
    tpu.vector_store %arg2[%c9, %71, %c0_29], %70 {strides = array<i32>} : memref<24x16x128xf32, #tpu.memory_space<vmem>>, vector<1x16x128xf32>,
    %cst_30 = arith.constant 1.62018514 : f32
    %73 = vector.broadcast %cst_30 : f32 to vector<1x16x128xf32>
    %74 = arith.mulf %73, %5 : vector<1x16x128xf32>
    %75 = arith.mulf %74, %62 : vector<1x16x128xf32>
    %c10 = arith.constant 10 : index
    %76 = arith.index_cast %3 : i32 to index
    %c0_31 = arith.constant 0 : index
    %77 = vector.load %arg2[%c10, %76, %c0_31] : memref<24x16x128xf32, #tpu.memory_space<vmem>>, vector<1x16x128xf32>
    tpu.vector_store %arg2[%c10, %76, %c0_31], %75 {strides = array<i32>} : memref<24x16x128xf32, #tpu.memory_space<vmem>>, vector<1x16x128xf32>,
    %cst_32 = arith.constant 1.32287562 : f32
    %78 = vector.broadcast %cst_32 : f32 to vector<1x16x128xf32>
    %79 = arith.mulf %78, %7 : vector<1x16x128xf32>
    %cst_33 = arith.constant 2.000000e+00 : f32
    %80 = vector.broadcast %cst_33 : f32 to vector<1x16x128xf32>
    %81 = arith.mulf %80, %23 : vector<1x16x128xf32>
    %cst_34 = arith.constant 3.000000e+00 : f32
    %82 = vector.broadcast %cst_34 : f32 to vector<1x16x128xf32>
    %83 = arith.mulf %82, %53 : vector<1x16x128xf32>
    %84 = arith.subf %81, %83 : vector<1x16x128xf32>
    %85 = arith.mulf %79, %84 : vector<1x16x128xf32>
    %c11 = arith.constant 11 : index
    %86 = arith.index_cast %3 : i32 to index
    %c0_35 = arith.constant 0 : index
    %87 = vector.load %arg2[%c11, %86, %c0_35] : memref<24x16x128xf32, #tpu.memory_space<vmem>>, vector<1x16x128xf32>
    tpu.vector_store %arg2[%c11, %86, %c0_35], %85 {strides = array<i32>} : memref<24x16x128xf32, #tpu.memory_space<vmem>>, vector<1x16x128xf32>,
    %cst_36 = arith.constant 1.62018514 : f32
    %88 = vector.broadcast %cst_36 : f32 to vector<1x16x128xf32>
    %89 = arith.mulf %88, %9 : vector<1x16x128xf32>
    %90 = arith.mulf %89, %62 : vector<1x16x128xf32>
    %c12 = arith.constant 12 : index
    %91 = arith.index_cast %3 : i32 to index
    %c0_37 = arith.constant 0 : index
    %92 = vector.load %arg2[%c12, %91, %c0_37] : memref<24x16x128xf32, #tpu.memory_space<vmem>>, vector<1x16x128xf32>
    tpu.vector_store %arg2[%c12, %91, %c0_37], %90 {strides = array<i32>} : memref<24x16x128xf32, #tpu.memory_space<vmem>>, vector<1x16x128xf32>,
    %cst_38 = arith.constant 5.12347555 : f32
    %93 = vector.broadcast %cst_38 : f32 to vector<1x16x128xf32>
    %94 = arith.mulf %93, %7 : vector<1x16x128xf32>
    %95 = arith.mulf %94, %28 : vector<1x16x128xf32>
    %c13 = arith.constant 13 : index
    %96 = arith.index_cast %3 : i32 to index
    %c0_39 = arith.constant 0 : index
    %97 = vector.load %arg2[%c13, %96, %c0_39] : memref<24x16x128xf32, #tpu.memory_space<vmem>>, vector<1x16x128xf32>
    tpu.vector_store %arg2[%c13, %96, %c0_39], %95 {strides = array<i32>} : memref<24x16x128xf32, #tpu.memory_space<vmem>>, vector<1x16x128xf32>,
    %cst_40 = arith.constant 2.091650e+00 : f32
    %98 = vector.broadcast %cst_40 : f32 to vector<1x16x128xf32>
    %99 = arith.mulf %98, %9 : vector<1x16x128xf32>
    %100 = arith.mulf %99, %59 : vector<1x16x128xf32>
    %c14 = arith.constant 14 : index
    %101 = arith.index_cast %3 : i32 to index
    %c0_41 = arith.constant 0 : index
    %102 = vector.load %arg2[%c14, %101, %c0_41] : memref<24x16x128xf32, #tpu.memory_space<vmem>>, vector<1x16x128xf32>
    tpu.vector_store %arg2[%c14, %101, %c0_41], %100 {strides = array<i32>} : memref<24x16x128xf32, #tpu.memory_space<vmem>>, vector<1x16x128xf32>,
    %103 = arith.addf %53, %23 : vector<1x16x128xf32>
    %cst_42 = arith.constant 7.000000e+00 : f32
    %104 = vector.broadcast %cst_42 : f32 to vector<1x16x128xf32>
    %105 = arith.mulf %104, %23 : vector<1x16x128xf32>
    %106 = arith.subf %105, %103 : vector<1x16x128xf32>
    %cst_43 = arith.constant 7.000000e+00 : f32
    %107 = vector.broadcast %cst_43 : f32 to vector<1x16x128xf32>
    %108 = arith.mulf %107, %23 : vector<1x16x128xf32>
    %cst_44 = arith.constant 3.000000e+00 : f32
    %109 = vector.broadcast %cst_44 : f32 to vector<1x16x128xf32>
    %110 = arith.mulf %109, %103 : vector<1x16x128xf32>
    %111 = arith.subf %108, %110 : vector<1x16x128xf32>
    %cst_45 = arith.constant 8.87411975 : f32
    %112 = vector.broadcast %cst_45 : f32 to vector<1x16x128xf32>
    %113 = arith.mulf %112, %26 : vector<1x16x128xf32>
    %114 = arith.mulf %113, %28 : vector<1x16x128xf32>
    %c15 = arith.constant 15 : index
    %115 = arith.index_cast %3 : i32 to index
    %c0_46 = arith.constant 0 : index
    %116 = vector.load %arg2[%c15, %115, %c0_46] : memref<24x16x128xf32, #tpu.memory_space<vmem>>, vector<1x16x128xf32>
    tpu.vector_store %arg2[%c15, %115, %c0_46], %114 {strides = array<i32>} : memref<24x16x128xf32, #tpu.memory_space<vmem>>, vector<1x16x128xf32>,
    %cst_47 = arith.constant 6.274950e+00 : f32
    %117 = vector.broadcast %cst_47 : f32 to vector<1x16x128xf32>
    %118 = arith.mulf %117, %25 : vector<1x16x128xf32>
    %119 = arith.mulf %118, %56 : vector<1x16x128xf32>
    %c16 = arith.constant 16 : index
    %120 = arith.index_cast %3 : i32 to index
    %c0_48 = arith.constant 0 : index
    %121 = vector.load %arg2[%c16, %120, %c0_48] : memref<24x16x128xf32, #tpu.memory_space<vmem>>, vector<1x16x128xf32>
    tpu.vector_store %arg2[%c16, %120, %c0_48], %119 {strides = array<i32>} : memref<24x16x128xf32, #tpu.memory_space<vmem>>, vector<1x16x128xf32>,
    %cst_49 = arith.constant 3.3541019 : f32
    %122 = vector.broadcast %cst_49 : f32 to vector<1x16x128xf32>
    %123 = arith.mulf %122, %26 : vector<1x16x128xf32>
    %124 = arith.mulf %123, %106 : vector<1x16x128xf32>
    %c17 = arith.constant 17 : index
    %125 = arith.index_cast %3 : i32 to index
    %c0_50 = arith.constant 0 : index
    %126 = vector.load %arg2[%c17, %125, %c0_50] : memref<24x16x128xf32, #tpu.memory_space<vmem>>, vector<1x16x128xf32>
    tpu.vector_store %arg2[%c17, %125, %c0_50], %124 {strides = array<i32>} : memref<24x16x128xf32, #tpu.memory_space<vmem>>, vector<1x16x128xf32>,
    %cst_51 = arith.constant 2.37170815 : f32
    %127 = vector.broadcast %cst_51 : f32 to vector<1x16x128xf32>
    %128 = arith.mulf %127, %25 : vector<1x16x128xf32>
    %129 = arith.mulf %128, %111 : vector<1x16x128xf32>
    %c18 = arith.constant 18 : index
    %130 = arith.index_cast %3 : i32 to index
    %c0_52 = arith.constant 0 : index
    %131 = vector.load %arg2[%c18, %130, %c0_52] : memref<24x16x128xf32, #tpu.memory_space<vmem>>, vector<1x16x128xf32>
    tpu.vector_store %arg2[%c18, %130, %c0_52], %129 {strides = array<i32>} : memref<24x16x128xf32, #tpu.memory_space<vmem>>, vector<1x16x128xf32>,
    %cst_53 = arith.constant 3.500000e+01 : f32
    %132 = vector.broadcast %cst_53 : f32 to vector<1x16x128xf32>
    %133 = arith.mulf %132, %23 : vector<1x16x128xf32>
    %134 = arith.mulf %133, %23 : vector<1x16x128xf32>
    %cst_54 = arith.constant 3.000000e+01 : f32
    %135 = vector.broadcast %cst_54 : f32 to vector<1x16x128xf32>
    %136 = arith.mulf %135, %23 : vector<1x16x128xf32>
    %137 = arith.mulf %136, %103 : vector<1x16x128xf32>
    %138 = arith.subf %134, %137 : vector<1x16x128xf32>
    %cst_55 = arith.constant 3.000000e+00 : f32
    %139 = vector.broadcast %cst_55 : f32 to vector<1x16x128xf32>
    %140 = arith.mulf %139, %103 : vector<1x16x128xf32>
    %141 = arith.mulf %140, %103 : vector<1x16x128xf32>
    %142 = arith.addf %138, %141 : vector<1x16x128xf32>
    %cst_56 = arith.constant 3.750000e-01 : f32
    %143 = vector.broadcast %cst_56 : f32 to vector<1x16x128xf32>
    %144 = arith.mulf %143, %142 : vector<1x16x128xf32>
    %c19 = arith.constant 19 : index
    %145 = arith.index_cast %3 : i32 to index
    %c0_57 = arith.constant 0 : index
    %146 = vector.load %arg2[%c19, %145, %c0_57] : memref<24x16x128xf32, #tpu.memory_space<vmem>>, vector<1x16x128xf32>
    tpu.vector_store %arg2[%c19, %145, %c0_57], %144 {strides = array<i32>} : memref<24x16x128xf32, #tpu.memory_space<vmem>>, vector<1x16x128xf32>,
    %cst_58 = arith.constant 2.37170815 : f32
    %147 = vector.broadcast %cst_58 : f32 to vector<1x16x128xf32>
    %148 = arith.mulf %147, %27 : vector<1x16x128xf32>
    %149 = arith.mulf %148, %111 : vector<1x16x128xf32>
    %c20 = arith.constant 20 : index
    %150 = arith.index_cast %3 : i32 to index
    %c0_59 = arith.constant 0 : index
    %151 = vector.load %arg2[%c20, %150, %c0_59] : memref<24x16x128xf32, #tpu.memory_space<vmem>>, vector<1x16x128xf32>
    tpu.vector_store %arg2[%c20, %150, %c0_59], %149 {strides = array<i32>} : memref<24x16x128xf32, #tpu.memory_space<vmem>>, vector<1x16x128xf32>,
    %cst_60 = arith.constant 1.67705095 : f32
    %152 = vector.broadcast %cst_60 : f32 to vector<1x16x128xf32>
    %153 = arith.mulf %152, %28 : vector<1x16x128xf32>
    %154 = arith.mulf %153, %106 : vector<1x16x128xf32>
    %c21 = arith.constant 21 : index
    %155 = arith.index_cast %3 : i32 to index
    %c0_61 = arith.constant 0 : index
    %156 = vector.load %arg2[%c21, %155, %c0_61] : memref<24x16x128xf32, #tpu.memory_space<vmem>>, vector<1x16x128xf32>
    tpu.vector_store %arg2[%c21, %155, %c0_61], %154 {strides = array<i32>} : memref<24x16x128xf32, #tpu.memory_space<vmem>>, vector<1x16x128xf32>,
    %cst_62 = arith.constant 6.274950e+00 : f32
    %157 = vector.broadcast %cst_62 : f32 to vector<1x16x128xf32>
    %158 = arith.mulf %157, %27 : vector<1x16x128xf32>
    %159 = arith.mulf %158, %59 : vector<1x16x128xf32>
    %c22 = arith.constant 22 : index
    %160 = arith.index_cast %3 : i32 to index
    %c0_63 = arith.constant 0 : index
    %161 = vector.load %arg2[%c22, %160, %c0_63] : memref<24x16x128xf32, #tpu.memory_space<vmem>>, vector<1x16x128xf32>
    tpu.vector_store %arg2[%c22, %160, %c0_63], %159 {strides = array<i32>} : memref<24x16x128xf32, #tpu.memory_space<vmem>>, vector<1x16x128xf32>,
    %162 = arith.mulf %24, %24 : vector<1x16x128xf32>
    %cst_64 = arith.constant 6.000000e+00 : f32
    %163 = vector.broadcast %cst_64 : f32 to vector<1x16x128xf32>
    %164 = arith.mulf %163, %24 : vector<1x16x128xf32>
    %165 = arith.mulf %164, %22 : vector<1x16x128xf32>
    %166 = arith.subf %162, %165 : vector<1x16x128xf32>
    %167 = arith.mulf %22, %22 : vector<1x16x128xf32>
    %168 = arith.addf %166, %167 : vector<1x16x128xf32>
    %cst_65 = arith.constant 2.218530e+00 : f32
    %169 = vector.broadcast %cst_65 : f32 to vector<1x16x128xf32>
    %170 = arith.mulf %169, %168 : vector<1x16x128xf32>
    %c23 = arith.constant 23 : index
    %171 = arith.index_cast %3 : i32 to index
    %c0_66 = arith.constant 0 : index
    %172 = vector.load %arg2[%c23, %171, %c0_66] : memref<24x16x128xf32, #tpu.memory_space<vmem>>, vector<1x16x128xf32>
    tpu.vector_store %arg2[%c23, %171, %c0_66], %170 {strides = array<i32>} : memref<24x16x128xf32, #tpu.memory_space<vmem>>, vector<1x16x128xf32>,
    %c1_i32_67 = arith.constant 1 : i32
    return
  }
  func.func @transform_0(%arg0: i32) -> (i32, i32, i32) {
    %c0_i32 = arith.constant 0 : i32
    %c0_i32_0 = arith.constant 0 : i32
    %c0_i32_1 = arith.constant 0 : i32
    return %c0_i32, %arg0, %c0_i32_0 : i32, i32, i32
  }
  func.func @transform_1(%arg0: i32) -> (i32, i32, i32) {
    %c0_i32 = arith.constant 0 : i32
    %c0_i32_0 = arith.constant 0 : i32
    %c0_i32_1 = arith.constant 0 : i32
    return %c0_i32, %arg0, %c0_i32_0 : i32, i32, i32
  }
}

</mosaic_0001>

<bundles_post_ra>
// kernel: tpu_custom_call.1
= control target key start
LH: loop header
LB: loop body
LE: loop exit
PB: predicated region body
PF: predicated region fallthrough
CT: control target
= control target key end

     0   :  { %6 = vsyncpa [#allocation3], 0  ;;  %s593_s0 = inlined_call_operand.hbm [shape: f32[3,16,128], index: 0, kind: input, shape index: {}]   ;;  %s594_s1 = inlined_call_operand.hbm [shape: f32[24,16,128], index: 1, kind: output, shape index: {}]  }
   0x1   :  { %7 = vsyncpa [#allocation4], 0  ;;  %s369_s6 = smov [#allocation2]   ;;  %s321_s10 = scalar_lea.hbm %s593_s0, 768 }
   0x2   :  { %s13_s7 = sshll.u32 %s369_s6, 4  ;;  %p322_p0 = scmp.ne.s32.totalorder %s593_s0, %s321_s10  ;;  %s14_s7 = int_to_ptr.vmem [resolvable:$true] %s13_s7 }
   0x3   :  { %p325_p1 = scmp.lt.u32.totalorder %s321_s10, %s593_s0 }
   0x5   :  { %p327_p2 = pnand %p325_p1, %p322_p0 }
   0x7   :  { %330 = shalt.err (!%p327_p2)
}
   0x8   :  { %s331_s15 = scalar_lea.vmem %s14_s7, 768  ;;  %p336_p4 = scmp.lt.s32.totalorder %s14_s7, %s14_s7 }
   0x9   :  { %p332_p3 = scmp.ne.s32.totalorder %s14_s7, %s331_s15  ;;  %p337_p5 = scmp.lt.s32.totalorder %s331_s15, %s331_s15 }
   0xb   :  { %p338_p6 = por %p337_p5, %p336_p4 }
   0xd   :  { %p339_p7 = pnand %p338_p6, %p332_p3 }
   0xf   :  { %342 = shalt.err (!%p339_p7)
}
  0x10   :  { %s370_s16 = smov 128   ;;  %s371_s17 = smov 8  }
  0x11   :  { %19 = dma.hbm_to_vmem [thread:$0]  %s593_s0, 768, %s14_s7, [#allocation3], %s370_s16, %s370_s16, %s371_s17  }
  0x12   :  { %365 = dma.done.wait [#allocation3], 768  }
  0x13   :  { %366 = vsyncadd [#allocation3], 4294966528  ;;  %v398_v0 = vld [vmem:[#allocation2] sm:$0xff]  ;;  %v400_v1 = vld [vmem:[#allocation2 + $0x8] sm:$0xff]  ;;  %s372_s0 = smov [#allocation5]  }
  0x14   :  { %v402_v2 = vld [vmem:[#allocation2 + $0x10] sm:$0xff]  ;;  %v33_v3 = vmul.f32 1.7320508, %v398_v0  ;;  %v407_v4 = vmul.f32 %v398_v0, %v398_v0  ;;  %v34_v5 = vmul.f32 1.7320508, %v400_v1  ;;  %v412_v6 = vmul.f32 %v400_v1, %v400_v1  ;;  %v414_v7 = vld [vmem:[#allocation2 + $0x18] sm:$0xff] }
  0x15   :  { %v416_v8 = vld [vmem:[#allocation2 + $0x20] sm:$0xff]  ;;  %v37_v9 = vmul.f32 1.7320508, %v402_v2  ;;  %v421_v10 = vmul.f32 %v402_v2, %v402_v2  ;;  %v38_v11 = vmul.f32 1.7320508, %v414_v7  ;;  %v426_v12 = vmul.f32 %v414_v7, %v414_v7  ;;  %v428_v13 = vld [vmem:[#allocation2 + $0x28] sm:$0xff] }
  0x16   :  { %35 = vst [vmem:[#allocation5] sm:$0xff] %v33_v3  ;;  %36 = vst [vmem:[#allocation5 + $0x8] sm:$0xff] %v34_v5  ;;  %v42_v14 = vmul.f32 1.7320508, %v416_v8  ;;  %v433_v15 = vmul.f32 %v416_v8, %v416_v8  ;;  %v43_v16 = vmul.f32 1.7320508, %v428_v13  ;;  %v438_v17 = vmul.f32 %v428_v13, %v428_v13 }
  0x17   :  { %40 = vst [vmem:[#allocation5 + $0x10] sm:$0xff] %v37_v9  ;;  %41 = vst [vmem:[#allocation5 + $0x18] sm:$0xff] %v38_v11  ;;  %v442_v18 = vmul.f32 %v416_v8, %v398_v0  ;;  %v446_v19 = vmul.f32 %v428_v13, %v400_v1  ;;  %v450_v20 = vmul.f32 %v402_v2, %v398_v0  ;;  %v109_v40 = vmul.f32 2.09165, %v398_v0  ;;  %s280_s20 = sshll.u32 %s372_s0, 4  ;;  %s281_s20 = int_to_ptr.vmem [resolvable:$true] %s280_s20 }
  0x18   :  { %v454_v21 = vmul.f32 %v414_v7, %v400_v1  ;;  %45 = vst [vmem:[#allocation5 + $0x20] sm:$0xff] %v42_v14  ;;  %46 = vst [vmem:[#allocation5 + $0x28] sm:$0xff] %v43_v16  ;;  %v458_v22 = vadd.f32 %v433_v15, %v407_v4  ;;  %v462_v23 = vadd.f32 %v438_v17, %v412_v6  ;;  %v97_v37 = vmul.f32 3.0, %v433_v15  ;;  %s343_s21 = scalar_lea.vmem %s281_s20, 6144  ;;  %p348_p9 = scmp.lt.s32.totalorder %s281_s20, %s281_s20 }
  0x19   :  { %v466_v24 = vmul.f32 %v416_v8, %v402_v2  ;;  %v470_v25 = vmul.f32 %v428_v13, %v414_v7  ;;  %v61_v26 = vmul.f32 3.8729835, %v442_v18  ;;  %v62_v27 = vmul.f32 3.8729835, %v446_v19  ;;  %p344_p8 = scmp.ne.s32.totalorder %s281_s20, %s343_s21  ;;  %p349_p10 = scmp.lt.s32.totalorder %s343_s21, %s343_s21 }
  0x1a   :  { %v67_v28 = vmul.f32 3.8729835, %v450_v20  ;;  %v477_v29 = vsub.f32 %v433_v15, %v407_v4  ;;  %v68_v30 = vmul.f32 3.8729835, %v454_v21  ;;  %v75_v31 = vmul.f32 0.5, %v458_v22 }
  0x1b   :  { %v76_v32 = vmul.f32 0.5, %v462_v23  ;;  %v85_v33 = vmul.f32 3.8729835, %v466_v24  ;;  %65 = vst [vmem:[#allocation5 + $0x30] sm:$0xff] %v61_v26  ;;  %66 = vst [vmem:[#allocation5 + $0x38] sm:$0xff] %v62_v27  ;;  %v487_v36 = vsub.f32 %v438_v17, %v412_v6  ;;  %v98_v41 = vmul.f32 3.0, %v438_v17  ;;  %p350_p11 = por %p349_p10, %p348_p9 }
  0x1c   :  { %71 = vst [vmem:[#allocation5 + $0x40] sm:$0xff] %v67_v28  ;;  %v86_v34 = vmul.f32 3.8729835, %v470_v25  ;;  %v91_v35 = vmul.f32 1.9364917, %v477_v29  ;;  %72 = vst [vmem:[#allocation5 + $0x48] sm:$0xff] %v68_v30  ;;  %v77_v38 = vsub.f32 %v421_v10, %v75_v31  ;;  %v496_v43 = vsub.f32 %v97_v37, %v407_v4 }
  0x1d   :  { %v78_v39 = vsub.f32 %v426_v12, %v76_v32  ;;  %89 = vst [vmem:[#allocation5 + $0x60] sm:$0xff] %v85_v33  ;;  %v92_v42 = vmul.f32 1.9364917, %v487_v36  ;;  %v110_v44 = vmul.f32 2.09165, %v400_v1  ;;  %v501_v48 = vsub.f32 %v98_v41, %v412_v6  ;;  %p351_p12 = pnand %p350_p11, %p344_p8 }
  0x1e   :  { %90 = vst [vmem:[#allocation5 + $0x68] sm:$0xff] %v86_v34  ;;  %95 = vst [vmem:[#allocation5 + $0x70] sm:$0xff] %v91_v35  ;;  %v117_v45 = vmul.f32 10.246951, %v450_v20  ;;  %v79_v46 = vmul.f32 2.236068, %v77_v38  ;;  %v111_v50 = vmul.f32 %v109_v40, %v496_v43 }
  0x1f   :  { %v80_v47 = vmul.f32 2.236068, %v78_v39  ;;  %v118_v49 = vmul.f32 10.246951, %v454_v21  ;;  %96 = vst [vmem:[#allocation5 + $0x78] sm:$0xff] %v92_v42  ;;  %v105_v52 = vmul.f32 4.0, %v421_v10  ;;  %v112_v54 = vmul.f32 %v110_v44, %v501_v48 }
  0x20   :  { %v119_v51 = vmul.f32 %v117_v45, %v416_v8  ;;  %v125_v53 = vmul.f32 1.6201851, %v398_v0  ;;  %83 = vst [vmem:[#allocation5 + $0x50] sm:$0xff] %v79_v46  ;;  %v106_v56 = vmul.f32 4.0, %v426_v12  ;;  %v126_v57 = vmul.f32 1.6201851, %v400_v1 }
  0x21   :  { %84 = vst [vmem:[#allocation5 + $0x58] sm:$0xff] %v80_v47  ;;  %v120_v55 = vmul.f32 %v118_v49, %v428_v13  ;;  %115 = vst [vmem:[#allocation5 + $0x80] sm:$0xff] %v111_v50  ;;  %v107_v58 = vsub.f32 %v105_v52, %v458_v22  ;;  %v133_v59 = vmul.f32 1.3228756, %v402_v2  ;;  %v135_v60 = vmul.f32 2.0, %v421_v10 }
  0x22   :  { %123 = vst [vmem:[#allocation5 + $0x90] sm:$0xff] %v119_v51  ;;  %v137_v61 = vmul.f32 3.0, %v458_v22  ;;  %116 = vst [vmem:[#allocation5 + $0x88] sm:$0xff] %v112_v54  ;;  %v108_v62 = vsub.f32 %v106_v56, %v462_v23  ;;  %v134_v63 = vmul.f32 1.3228756, %v414_v7  ;;  %v136_v0 = vmul.f32 2.0, %v426_v12 }
  0x23   :  { %124 = vst [vmem:[#allocation5 + $0x98] sm:$0xff] %v120_v55  ;;  %v138_v1 = vmul.f32 3.0, %v462_v23  ;;  %v127_v3 = vmul.f32 %v125_v53, %v107_v58  ;;  %v147_v9 = vmul.f32 1.6201851, %v416_v8  ;;  %v148_v11 = vmul.f32 1.6201851, %v428_v13 }
  0x24   :  { %v139_v5 = vsub.f32 %v135_v60, %v137_v61  ;;  %v128_v14 = vmul.f32 %v126_v57, %v108_v62  ;;  %v155_v26 = vmul.f32 5.1234756, %v402_v2  ;;  %v156_v27 = vmul.f32 5.1234756, %v414_v7 }
  0x25   :  { %v140_v16 = vsub.f32 %v136_v0, %v138_v1  ;;  %131 = vst [vmem:[#allocation5 + $0xa0] sm:$0xff] %v127_v3  ;;  %v149_v30 = vmul.f32 %v147_v9, %v107_v58  ;;  %v150_v31 = vmul.f32 %v148_v11, %v108_v62  ;;  %v101_v32 = vmul.f32 3.0, %v407_v4 }
  0x26   :  { %v141_v28 = vmul.f32 %v139_v5, %v133_v59  ;;  %132 = vst [vmem:[#allocation5 + $0xa8] sm:$0xff] %v128_v14  ;;  %v157_v34 = vmul.f32 %v155_v26, %v477_v29  ;;  %v158_v35 = vmul.f32 %v156_v27, %v487_v36  ;;  %v163_v37 = vmul.f32 2.09165, %v416_v8 }
  0x27   :  { %v142_v33 = vmul.f32 %v140_v16, %v134_v63  ;;  %153 = vst [vmem:[#allocation5 + $0xc0] sm:$0xff] %v149_v30  ;;  %154 = vst [vmem:[#allocation5 + $0xc8] sm:$0xff] %v150_v31  ;;  %v529_v2 = vsub.f32 %v433_v15, %v101_v32  ;;  %v102_v7 = vmul.f32 3.0, %v412_v6  ;;  %v164_v38 = vmul.f32 2.09165, %v428_v13 }
  0x28   :  { %145 = vst [vmem:[#allocation5 + $0xb0] sm:$0xff] %v141_v28  ;;  %v181_v39 = vmul.f32 8.87412, %v442_v18  ;;  %161 = vst [vmem:[#allocation5 + $0xd0] sm:$0xff] %v157_v34  ;;  %v182_v40 = vmul.f32 8.87412, %v446_v19  ;;  %v171_v42 = vadd.f32 %v458_v22, %v421_v10  ;;  %v172_v53 = vadd.f32 %v462_v23, %v426_v12 }
  0x29   :  { %146 = vst [vmem:[#allocation5 + $0xb8] sm:$0xff] %v142_v33  ;;  %162 = vst [vmem:[#allocation5 + $0xd8] sm:$0xff] %v158_v35  ;;  %v189_v41 = vmul.f32 6.27495, %v450_v20  ;;  %v190_v8 = vmul.f32 6.27495, %v454_v21  ;;  %v165_v44 = vmul.f32 %v163_v37, %v529_v2  ;;  %v104_v45 = vsub.f32 %v438_v17, %v102_v7 }
  0x2a   :  { %v183_v13 = vmul.f32 %v181_v39, %v477_v29  ;;  %v173_v46 = vmul.f32 7.0, %v421_v10  ;;  %v184_v47 = vmul.f32 %v182_v40, %v487_v36  ;;  %v197_v51 = vmul.f32 3.354102, %v442_v18 }
  0x2b   :  { %v191_v49 = vmul.f32 %v189_v41, %v496_v43  ;;  %v192_v50 = vmul.f32 %v190_v8, %v501_v48  ;;  %169 = vst [vmem:[#allocation5 + $0xe0] sm:$0xff] %v165_v44  ;;  %v166_v52 = vmul.f32 %v164_v38, %v104_v45  ;;  %v174_v54 = vmul.f32 7.0, %v426_v12 }
  0x2c   :  { %187 = vst [vmem:[#allocation5 + $0xf0] sm:$0xff] %v183_v13  ;;  %v175_v22 = vsub.f32 %v173_v46, %v171_v42  ;;  %188 = vst [vmem:[#allocation5 + $0xf8] sm:$0xff] %v184_v47  ;;  %v198_v55 = vmul.f32 3.354102, %v446_v19  ;;  %v177_v56 = vmul.f32 3.0, %v171_v42  ;;  %v213_v48 = vmul.f32 35.0, %v421_v10 }
  0x2d   :  { %195 = vst [vmem:[#allocation5 + $0x100] sm:$0xff] %v191_v49  ;;  %196 = vst [vmem:[#allocation5 + $0x108] sm:$0xff] %v192_v50  ;;  %v205_v43 = vmul.f32 2.3717082, %v450_v20  ;;  %v176_v57 = vsub.f32 %v174_v54, %v172_v53  ;;  %v178_v58 = vmul.f32 3.0, %v172_v53  ;;  %v217_v61 = vmul.f32 30.0, %v421_v10 }
  0x2e   :  { %170 = vst [vmem:[#allocation5 + $0xe8] sm:$0xff] %v166_v52  ;;  %v199_v18 = vmul.f32 %v197_v51, %v175_v22  ;;  %v206_v59 = vmul.f32 2.3717082, %v454_v21  ;;  %v179_v60 = vsub.f32 %v173_v46, %v177_v56  ;;  %v215_v23 = vmul.f32 %v213_v48, %v421_v10 }
  0x2f   :  { %v223_v62 = vmul.f32 %v177_v56, %v171_v42  ;;  %v200_v63 = vmul.f32 %v198_v55, %v176_v57  ;;  %v180_v19 = vsub.f32 %v174_v54, %v178_v58  ;;  %v214_v0 = vmul.f32 35.0, %v426_v12 }
  0x30   :  { %203 = vst [vmem:[#allocation5 + $0x110] sm:$0xff] %v199_v18  ;;  %v218_v20 = vmul.f32 30.0, %v426_v12  ;;  %v207_v1 = vmul.f32 %v205_v43, %v179_v60  ;;  %v219_v3 = vmul.f32 %v217_v61, %v171_v42  ;;  %v224_v5 = vmul.f32 %v178_v58, %v172_v53 }
  0x31   :  { %v233_v9 = vmul.f32 2.3717082, %v466_v24  ;;  %204 = vst [vmem:[#allocation5 + $0x118] sm:$0xff] %v200_v63  ;;  %v208_v21 = vmul.f32 %v206_v59, %v180_v19  ;;  %v216_v11 = vmul.f32 %v214_v0, %v426_v12  ;;  %v234_v10 = vmul.f32 2.3717082, %v470_v25 }
  0x32   :  { %v220_v14 = vmul.f32 %v218_v20, %v172_v53  ;;  %211 = vst [vmem:[#allocation5 + $0x120] sm:$0xff] %v207_v1  ;;  %v221_v16 = vsub.f32 %v215_v23, %v219_v3  ;;  %v241_v27 = vmul.f32 1.677051, %v477_v29  ;;  %v242_v28 = vmul.f32 1.677051, %v487_v36 }
  0x33   :  { %v235_v26 = vmul.f32 %v233_v9, %v179_v60  ;;  %212 = vst [vmem:[#allocation5 + $0x128] sm:$0xff] %v208_v21  ;;  %v236_v31 = vmul.f32 %v234_v10, %v180_v19  ;;  %v249_v32 = vmul.f32 6.27495, %v466_v24  ;;  %v250_v33 = vmul.f32 6.27495, %v470_v25 }
  0x34   :  { %v222_v30 = vsub.f32 %v216_v11, %v220_v14  ;;  %v225_v34 = vadd.f32 %v223_v62, %v221_v16  ;;  %v243_v12 = vmul.f32 %v241_v27, %v175_v22  ;;  %v244_v35 = vmul.f32 %v242_v28, %v176_v57 }
  0x35   :  { %239 = vst [vmem:[#allocation5 + $0x140] sm:$0xff] %v235_v26  ;;  %v257_v37 = vmul.f32 %v433_v15, %v433_v15  ;;  %240 = vst [vmem:[#allocation5 + $0x148] sm:$0xff] %v236_v31  ;;  %v251_v29 = vmul.f32 %v249_v32, %v529_v2  ;;  %v252_v38 = vmul.f32 %v250_v33, %v104_v45  ;;  %v259_v36 = vmul.f32 6.0, %v433_v15 }
  0x36   :  { %v226_v7 = vadd.f32 %v224_v5, %v222_v30  ;;  %v227_v39 = vmul.f32 0.375, %v225_v34  ;;  %247 = vst [vmem:[#allocation5 + $0x150] sm:$0xff] %v243_v12  ;;  %248 = vst [vmem:[#allocation5 + $0x158] sm:$0xff] %v244_v35  ;;  %v258_v24 = vmul.f32 %v438_v17, %v438_v17  ;;  %v260_v25 = vmul.f32 6.0, %v438_v17 }
  0x37   :  { %255 = vst [vmem:[#allocation5 + $0x160] sm:$0xff] %v251_v29  ;;  %256 = vst [vmem:[#allocation5 + $0x168] sm:$0xff] %v252_v38  ;;  %v261_v41 = vmul.f32 %v259_v36, %v407_v4  ;;  %v265_v8 = vmul.f32 %v407_v4, %v407_v4  ;;  %v266_v15 = vmul.f32 %v412_v6, %v412_v6 }
  0x38   :  { %v228_v40 = vmul.f32 0.375, %v226_v7  ;;  %231 = vst [vmem:[#allocation5 + $0x130] sm:$0xff] %v227_v39  ;;  %v262_v2 = vmul.f32 %v260_v25, %v412_v6 }
  0x39   :  { %v263_v42 = vsub.f32 %v257_v37, %v261_v41 }
  0x3a   :  { %232 = vst [vmem:[#allocation5 + $0x138] sm:$0xff] %v228_v40  ;;  %v264_v44 = vsub.f32 %v258_v24, %v262_v2 }
  0x3b   :  { %v267_v45 = vadd.f32 %v265_v8, %v263_v42 }
  0x3c   :  { %v268_v17 = vadd.f32 %v266_v15, %v264_v44 }
  0x3d   :  { %v269_v13 = vmul.f32 2.21853, %v267_v45 }
  0x3e   :  { %v270_v46 = vmul.f32 2.21853, %v268_v17 }
  0x3f   :  { %273 = vst [vmem:[#allocation5 + $0x170] sm:$0xff] %v269_v13 }
  0x40   :  { %274 = vst [vmem:[#allocation5 + $0x178] sm:$0xff] %v270_v46 }
  0x41   :  { %354 = shalt.err (!%p351_p12)
}
  0x42   :  { %s355_s24 = scalar_lea.hbm %s594_s1, 6144 }
  0x43   :  { %p356_p13 = scmp.ne.s32.totalorder %s594_s1, %s355_s24  ;;  %p359_p0 = scmp.lt.u32.totalorder %s355_s24, %s594_s1 }
  0x45   :  { %p361_p1 = pnand %p359_p0, %p356_p13 }
  0x47   :  { %364 = shalt.err (!%p361_p1)
}
  0x48   :  { %286 = dma.vmem_to_hbm [thread:$0]  %s281_s20, 6144, %s594_s1, [#allocation4], %s370_s16, %s370_s16, %s371_s17  }
  0x49   :  { %367 = dma.done.wait [#allocation4], 6144  }
  0x4a   :  { %368 = vsyncadd [#allocation4], 4294961152 }
  0x4b   :  { %290 = vsyncpa [#allocation3], 1 }
  0x4c   :  { %291 = vsyncpa [#allocation4], 1 }

</bundles_post_ra>
